<compile_context>
chip_gen: v7x
topology: tpu7x:2x2x1
jax: 0.10.0
libtpu: 0.0.40
codegen_flags: <defaults>
</compile_context>

<pallas_src>
import functools

import jax
import jax.numpy as jnp
from jax.experimental import pallas as pl
from jax.experimental.pallas import tpu as pltpu

_SUBLANE = 8
_TILE_CANDIDATES = (256, 128, 64, 32, 16, 8)


def _round_up(x, m):
    return ((x + m - 1) // m) * m


def _tpu_kind():
    try:
        return jax.devices()[0].device_kind.lower()
    except Exception:
        return ""


# ---------------------------------------------------------------------------
# Fused Pallas kernel: x -> [Linear (+ReLU)] * n_layers -> out, all in VMEM.
# refs = (x_ref, w0_ref, b0_ref, w1_ref, b1_ref, ..., o_ref)
# ---------------------------------------------------------------------------
def _fused_mlp_kernel(*refs, n_layers, matmul_dtype):
    x_ref, o_ref = refs[0], refs[-1]
    # f32 accumulation always; HIGHEST precision in the pure-f32 path so the
    # kernel matches the f32 reference tightly.  bf16 path feeds MXU-native
    # operands (weights were pre-cast at prep time, so no per-tile w cast).
    prec = (jax.lax.Precision.HIGHEST if matmul_dtype == jnp.float32
            else jax.lax.Precision.DEFAULT)
    h = x_ref[...]
    for i in range(n_layers):                      # unrolled straight-line code
        w = refs[1 + 2 * i][...]                   # (in, out), pre-cast at prep
        b = refs[2 + 2 * i][...]                   # (1, out), f32
        lhs = h if h.dtype == matmul_dtype else h.astype(matmul_dtype)
        y = jnp.dot(lhs, w, preferred_element_type=jnp.float32, precision=prec)
        y = y + b                                  # f32 epilogue (v5e-safe)
        h = jnp.maximum(y, 0.0) if i != n_layers - 1 else y
    o_ref[...] = h.astype(o_ref.dtype)


# ---------------------------------------------------------------------------
# Parameter init (matches MLP.__init__: orthogonal_ weights, zero biases)
# ---------------------------------------------------------------------------
def orthogonal_init(key, out_dim, in_dim):
    """Orthogonal init equivalent to nn.init.orthogonal_ (gain=1)."""
    rows, cols = out_dim, in_dim
    flat = jax.random.normal(key, (max(rows, cols), min(rows, cols)), jnp.float32)
    q, r = jnp.linalg.qr(flat)
    d = jnp.sign(jnp.diagonal(r))
    q = q * d[None, :]
    if rows < cols:
        q = q.T
    return q[:rows, :cols]            # (out_dim, in_dim), torch Linear layout


def init_mlp_params(key, input_dim, hidden_dim, output_dim, hidden_depth):
    """Returns torch-layout params: list of (W (out,in), b (out,))."""
    if hidden_depth == 0:
        dims = [(input_dim, output_dim)]
    else:
        dims = [(input_dim, hidden_dim)]
        dims += [(hidden_dim, hidden_dim)] * (hidden_depth - 1)
        dims += [(hidden_dim, output_dim)]
    params = []
    for (d_in, d_out) in dims:
        key, sub = jax.random.split(key)
        w = orthogonal_init(sub, d_out, d_in)
        params.append((w, jnp.zeros((d_out,), jnp.float32)))
    return params


def prepare_params(params, matmul_dtype=jnp.float32):
    """One-time layout prep: transpose W to (in, out) and pre-cast to the
    matmul dtype (bf16 on v6e/v7x if desired); bias stays f32 as a (1, out)
    row for a clean splat.  No feature-dim padding: full-dim blocks are
    exempt from the (8,128) tiling rule, so the true sizes DMA as-is."""
    prepped = []
    for (w, b) in params:
        prepped.append((jnp.asarray(w.T, matmul_dtype),
                        jnp.asarray(b, jnp.float32).reshape(1, -1)))
    return prepped


# ---------------------------------------------------------------------------
# Batch-tile selection
# ---------------------------------------------------------------------------
def _choose_tile_b(batch, max_tile, two_cores):
    if two_cores and batch > 64:
        # v7x megacore: guarantee >=2 grid steps so both TCs get work.
        return min(max_tile, _round_up(pl.cdiv(batch, 2), _SUBLANE))
    # Otherwise: minimise padded-row waste; prefer the largest tile among ties.
    best_t, best_pad = _SUBLANE, _round_up(batch, _SUBLANE)
    for t in _TILE_CANDIDATES:
        if t > max_tile:
            continue
        pad = _round_up(batch, t)
        if pad < best_pad or (pad == best_pad and t > best_t):
            best_t, best_pad = t, pad
    return best_t


def _resident_spec(shape):
    """Weight/bias spec: constant block index -> resident in VMEM.  Single
    buffer (double-buffering a constant-index block only wastes VMEM)."""
    try:
        return pl.BlockSpec(shape, lambda i: (0, 0), pipeline_mode=pl.Buffered(1))
    except (TypeError, AttributeError):   # older jax without pipeline_mode
        return pl.BlockSpec(shape, lambda i: (0, 0))


# ---------------------------------------------------------------------------
# Fused forward wrapper
# ---------------------------------------------------------------------------
def mlp_forward(prepped_params, x, matmul_dtype=jnp.float32):
    batch, in_dim = x.shape
    n_layers = len(prepped_params)
    output_dim = prepped_params[-1][0].shape[1]

    kind = _tpu_kind()
    max_tile = 128 if "v5" in kind else 256       # v5e: halve vreg pressure
    two_cores = "v7" in kind                      # v7x: 2 TCs per chip
    tile_b = _choose_tile_b(batch, max_tile, two_cores)
    batch_pad = _round_up(batch, tile_b)

    # Row-pad only when needed (never for the demo shapes).
    x_in = x if batch_pad == batch else jnp.pad(x, ((0, batch_pad - batch), (0, 0)))

    inputs = [x_in]
    in_specs = [pl.BlockSpec((tile_b, in_dim), lambda i: (i, 0))]
    flops = 0
    weight_bytes = 0
    max_width = in_dim
    for (w_t, b_r) in prepped_params:
        inputs += [w_t, b_r]
        in_specs += [_resident_spec(w_t.shape), _resident_spec(b_r.shape)]
        flops += 2 * batch_pad * w_t.shape[0] * w_t.shape[1]
        weight_bytes += (w_t.size * w_t.dtype.itemsize + b_r.size * 4)
        max_width = max(max_width, w_t.shape[1])
    bytes_accessed = (x_in.size * x_in.dtype.itemsize
                      + batch_pad * output_dim * 4
                      + weight_bytes)

    # Explicit VMEM budget: single-buffered resident weights + double-buffered
    # in/out tiles + live f32 activations, with 2x headroom; never below the
    # 32 MiB default, capped well under v7x's 64 MiB physical VMEM.
    act_bytes = (2 * (tile_b * in_dim * x_in.dtype.itemsize
                      + tile_b * output_dim * 4)
                 + 2 * tile_b * max_width * 4)
    vmem_limit = min(max(2 * (weight_bytes + act_bytes) + (2 << 20), 32 << 20),
                     48 << 20)

    kernel = functools.partial(_fused_mlp_kernel,
                               n_layers=n_layers, matmul_dtype=matmul_dtype)

    out = pl.pallas_call(
        kernel,
        out_shape=jax.ShapeDtypeStruct((batch_pad, output_dim), jnp.float32),
        grid=(batch_pad // tile_b,),
        in_specs=in_specs,
        out_specs=pl.BlockSpec((tile_b, output_dim), lambda i: (i, 0)),
        compiler_params=pltpu.CompilerParams(
            dimension_semantics=("parallel",),     # shards batch grid on v7x
            vmem_limit_bytes=vmem_limit),
        cost_estimate=pl.CostEstimate(
            flops=flops, transcendentals=0, bytes_accessed=bytes_accessed),
    )(*inputs)

    return out if batch_pad == batch else out[:batch]


# ---------------------------------------------------------------------------
# Pure-JAX reference (unpadded, torch-layout params)
# ---------------------------------------------------------------------------
def mlp_reference(params, x):
    h = x
    n_layers = len(params)
    for i, (w, b) in enumerate(params):
        h = jnp.dot(h, w.T, precision=jax.lax.Precision.HIGHEST) + b
        if i != n_layers - 1:
            h = jnp.maximum(h, 0.0)
    return h


if __name__ == "__main__":
    batch = 8
    input_dim = 32
    hidden_dim = 32
    output_dim = 16
    hidden_depth = 2     # -> Linear, ReLU, Linear, ReLU, Linear

    key = jax.random.PRNGKey(0)
    key_x, key_p = jax.random.split(key)
    x = jax.random.normal(key_x, (batch, input_dim), jnp.float32)

    params = init_mlp_params(key_p, input_dim, hidden_dim, output_dim, hidden_depth)
    prepped = prepare_params(params)               # hoisted one-time layout prep
    # bf16 weight path for v6e/v7x inference:
    #   prepped = prepare_params(params, jnp.bfloat16)
    #   out = mlp_forward(prepped, x, matmul_dtype=jnp.bfloat16)   # loosen tol!

    out = mlp_forward(prepped, x)
    out = jax.block_until_ready(out)

    ref = mlp_reference(params, x)
    assert out.shape == (batch, output_dim)
    assert jnp.allclose(out, ref, atol=1e-5, rtol=1e-5), "mismatch vs reference"

    print("KERNEL_OK")
</pallas_src>

<mosaic_0001>
module attributes {stable_mosaic.version = 11 : i64} {
  func.func @_fused_mlp_kernel(%arg0: i32, %arg1: memref<8x32xf32, #tpu.memory_space<vmem>>, %arg2: memref<32x32xf32, #tpu.memory_space<vmem>>, %arg3: memref<1x32xf32, #tpu.memory_space<vmem>>, %arg4: memref<32x32xf32, #tpu.memory_space<vmem>>, %arg5: memref<1x32xf32, #tpu.memory_space<vmem>>, %arg6: memref<32x16xf32, #tpu.memory_space<vmem>>, %arg7: memref<1x16xf32, #tpu.memory_space<vmem>>, %arg8: memref<8x16xf32, #tpu.memory_space<vmem>>) attributes {dimension_semantics = [#tpu.dimension_semantics<parallel>], iteration_bounds = array<i64: 1>, scalar_prefetch = 0 : i64, scratch_operands = 0 : i64, tpu.core_type = #tpu.core_type<tc>, window_params = [{transform_indices = @transform_0, window_bounds = array<i64: 8, 32>}, {pipeline_mode = #tpu.pipeline_mode<synchronous>, transform_indices = @transform_1, window_bounds = array<i64: 32, 32>}, {pipeline_mode = #tpu.pipeline_mode<synchronous>, transform_indices = @transform_2, window_bounds = array<i64: 1, 32>}, {pipeline_mode = #tpu.pipeline_mode<synchronous>, transform_indices = @transform_3, window_bounds = array<i64: 32, 32>}, {pipeline_mode = #tpu.pipeline_mode<synchronous>, transform_indices = @transform_4, window_bounds = array<i64: 1, 32>}, {pipeline_mode = #tpu.pipeline_mode<synchronous>, transform_indices = @transform_5, window_bounds = array<i64: 32, 16>}, {pipeline_mode = #tpu.pipeline_mode<synchronous>, transform_indices = @transform_6, window_bounds = array<i64: 1, 16>}, {transform_indices = @transform_7, window_bounds = array<i64: 8, 16>}]} {
    %c0 = arith.constant 0 : index
    %c0_0 = arith.constant 0 : index
    %0 = vector.load %arg1[%c0, %c0_0] : memref<8x32xf32, #tpu.memory_space<vmem>>, vector<8x32xf32>
    %c0_1 = arith.constant 0 : index
    %c0_2 = arith.constant 0 : index
    %1 = vector.load %arg2[%c0_1, %c0_2] : memref<32x32xf32, #tpu.memory_space<vmem>>, vector<32x32xf32>
    %c0_3 = arith.constant 0 : index
    %c0_4 = arith.constant 0 : index
    %2 = vector.load %arg3[%c0_3, %c0_4] : memref<1x32xf32, #tpu.memory_space<vmem>>, vector<1x32xf32>
    %cst = arith.constant dense<0.000000e+00> : vector<8x32xf32>
    %3 = tpu.matmul %0, %1, %cst {dimension_numbers = #tpu.dot_dimension_numbers<[1], [0], [0], [1], [0, 0, 1, 1], [], []>, precision = #tpu.contract_precision<fp32>} : vector<8x32xf32>, vector<32x32xf32>, vector<8x32xf32> -> vector<8x32xf32>
    %4 = vector.broadcast %2 : vector<1x32xf32> to vector<8x32xf32>
    %5 = arith.addf %3, %4 : vector<8x32xf32>
    %cst_5 = arith.constant 0.000000e+00 : f32
    %6 = vector.broadcast %cst_5 : f32 to vector<8x32xf32>
    %7 = arith.maximumf %5, %6 : vector<8x32xf32>
    %c0_6 = arith.constant 0 : index
    %c0_7 = arith.constant 0 : index
    %8 = vector.load %arg4[%c0_6, %c0_7] : memref<32x32xf32, #tpu.memory_space<vmem>>, vector<32x32xf32>
    %c0_8 = arith.constant 0 : index
    %c0_9 = arith.constant 0 : index
    %9 = vector.load %arg5[%c0_8, %c0_9] : memref<1x32xf32, #tpu.memory_space<vmem>>, vector<1x32xf32>
    %cst_10 = arith.constant dense<0.000000e+00> : vector<8x32xf32>
    %10 = tpu.matmul %7, %8, %cst_10 {dimension_numbers = #tpu.dot_dimension_numbers<[1], [0], [0], [1], [0, 0, 1, 1], [], []>, precision = #tpu.contract_precision<fp32>} : vector<8x32xf32>, vector<32x32xf32>, vector<8x32xf32> -> vector<8x32xf32>
    %11 = vector.broadcast %9 : vector<1x32xf32> to vector<8x32xf32>
    %12 = arith.addf %10, %11 : vector<8x32xf32>
    %cst_11 = arith.constant 0.000000e+00 : f32
    %13 = vector.broadcast %cst_11 : f32 to vector<8x32xf32>
    %14 = arith.maximumf %12, %13 : vector<8x32xf32>
    %c0_12 = arith.constant 0 : index
    %c0_13 = arith.constant 0 : index
    %15 = vector.load %arg6[%c0_12, %c0_13] : memref<32x16xf32, #tpu.memory_space<vmem>>, vector<32x16xf32>
    %c0_14 = arith.constant 0 : index
    %c0_15 = arith.constant 0 : index
    %16 = vector.load %arg7[%c0_14, %c0_15] : memref<1x16xf32, #tpu.memory_space<vmem>>, vector<1x16xf32>
    %cst_16 = arith.constant dense<0.000000e+00> : vector<8x16xf32>
    %17 = tpu.matmul %14, %15, %cst_16 {dimension_numbers = #tpu.dot_dimension_numbers<[1], [0], [0], [1], [0, 0, 1, 1], [], []>, precision = #tpu.contract_precision<fp32>} : vector<8x32xf32>, vector<32x16xf32>, vector<8x16xf32> -> vector<8x16xf32>
    %18 = vector.broadcast %16 : vector<1x16xf32> to vector<8x16xf32>
    %19 = arith.addf %17, %18 : vector<8x16xf32>
    %c0_17 = arith.constant 0 : index
    %c0_18 = arith.constant 0 : index
    %20 = vector.load %arg8[%c0_17, %c0_18] : memref<8x16xf32, #tpu.memory_space<vmem>>, vector<8x16xf32>
    tpu.vector_store %arg8[%c0_17, %c0_18], %19 {strides = array<i32>} : memref<8x16xf32, #tpu.memory_space<vmem>>, vector<8x16xf32>,
    return
  }
  func.func @transform_0(%arg0: i32) -> (i32, i32) {
    %c0_i32 = arith.constant 0 : i32
    %c0_i32_0 = arith.constant 0 : i32
    return %arg0, %c0_i32 : i32, i32
  }
  func.func @transform_1(%arg0: i32) -> (i32, i32) {
    %c0_i32 = arith.constant 0 : i32
    %c0_i32_0 = arith.constant 0 : i32
    %c0_i32_1 = arith.constant 0 : i32
    return %c0_i32, %c0_i32_0 : i32, i32
  }
  func.func @transform_2(%arg0: i32) -> (i32, i32) {
    %c0_i32 = arith.constant 0 : i32
    %c0_i32_0 = arith.constant 0 : i32
    %c0_i32_1 = arith.constant 0 : i32
    return %c0_i32, %c0_i32_0 : i32, i32
  }
  func.func @transform_3(%arg0: i32) -> (i32, i32) {
    %c0_i32 = arith.constant 0 : i32
    %c0_i32_0 = arith.constant 0 : i32
    %c0_i32_1 = arith.constant 0 : i32
    return %c0_i32, %c0_i32_0 : i32, i32
  }
  func.func @transform_4(%arg0: i32) -> (i32, i32) {
    %c0_i32 = arith.constant 0 : i32
    %c0_i32_0 = arith.constant 0 : i32
    %c0_i32_1 = arith.constant 0 : i32
    return %c0_i32, %c0_i32_0 : i32, i32
  }
  func.func @transform_5(%arg0: i32) -> (i32, i32) {
    %c0_i32 = arith.constant 0 : i32
    %c0_i32_0 = arith.constant 0 : i32
    %c0_i32_1 = arith.constant 0 : i32
    return %c0_i32, %c0_i32_0 : i32, i32
  }
  func.func @transform_6(%arg0: i32) -> (i32, i32) {
    %c0_i32 = arith.constant 0 : i32
    %c0_i32_0 = arith.constant 0 : i32
    %c0_i32_1 = arith.constant 0 : i32
    return %c0_i32, %c0_i32_0 : i32, i32
  }
  func.func @transform_7(%arg0: i32) -> (i32, i32) {
    %c0_i32 = arith.constant 0 : i32
    %c0_i32_0 = arith.constant 0 : i32
    return %arg0, %c0_i32 : i32, i32
  }
}

</mosaic_0001>

<bundles_post_ra>
// kernel: tpu_custom_call.1
= control target key start
LH: loop header
LB: loop body
LE: loop exit
PB: predicated region body
PF: predicated region fallthrough
CT: control target
= control target key end

     0   :  { %12 = vsyncpa [#allocation3], 0  ;;  %s2237_s0 = inlined_call_operand.vmem [shape: f32[8,32], index: 0, kind: input, shape index: {}]   ;;  %s2238_s1 = inlined_call_operand.vmem [shape: f32[32,32], index: 1, kind: input, shape index: {}]   ;;  %s2239_s2 = inlined_call_operand.vmem [shape: f32[1,32], index: 2, kind: input, shape index: {}]   ;;  %s2240_s3 = inlined_call_operand.hbm [shape: f32[32,32], index: 3, kind: input, shape index: {}]   ;;  %s2241_s4 = inlined_call_operand.vmem [shape: f32[1,32], index: 4, kind: input, shape index: {}]   ;;  %s2242_s5 = inlined_call_operand.vmem [shape: f32[32,16], index: 5, kind: input, shape index: {}]   ;;  %s2243_s6 = inlined_call_operand.vmem [shape: f32[1,16], index: 6, kind: input, shape index: {}]   ;;  %s2244_s7 = inlined_call_operand.hbm [shape: f32[8,16], index: 7, kind: output, shape index: {}]  }
   0x1   :  { %13 = vsyncpa [#allocation4], 0  ;;  %s2045_s24 = smov [#allocation2]   ;;  %s1997_s28 = scalar_lea.hbm %s2240_s3, 512 }
   0x2   :  { %s25_s25 = sshll.u32 %s2045_s24, 4  ;;  %p1998_p0 = scmp.ne.s32.totalorder %s2240_s3, %s1997_s28  ;;  %s26_s25 = int_to_ptr.vmem [resolvable:$true] %s25_s25 }
   0x3   :  { %p2001_p1 = scmp.lt.u32.totalorder %s1997_s28, %s2240_s3 }
   0x5   :  { %p2003_p2 = pnand %p2001_p1, %p1998_p0 }
   0x7   :  { %2006 = shalt.err (!%p2003_p2)
}
   0x8   :  { %s2007_s10 = scalar_lea.vmem %s26_s25, 512  ;;  %p2012_p4 = scmp.lt.s32.totalorder %s26_s25, %s26_s25 }
   0x9   :  { %p2008_p3 = scmp.ne.s32.totalorder %s26_s25, %s2007_s10  ;;  %p2013_p5 = scmp.lt.s32.totalorder %s2007_s10, %s2007_s10 }
   0xb   :  { %p2014_p6 = por %p2013_p5, %p2012_p4 }
   0xd   :  { %p2015_p7 = pnand %p2014_p6, %p2008_p3 }
   0xf   :  { %2018 = shalt.err (!%p2015_p7)
}
  0x10   :  { %s2046_s11 = smov 128   ;;  %s2047_s12 = smov 8  }
  0x11   :  { %31 = dma.hbm_to_vmem [thread:$0]  %s2240_s3, 512, %s26_s25, [#allocation3], %s2046_s11, %s2046_s11, %s2047_s12  }
  0x12   :  { %2041 = dma.done.wait [#allocation3], 512  }
  0x13   :  { %2042 = vsyncadd [#allocation3], 4294966784  ;;  %v2048_v0 = vmov 0.0|0.0   ;;  %vm2049_vm0 = vmmov 0   ;;  %v2050_v1 = vmov 0.0   ;;  %vm53_vm1 = vcmask 261120  }
  0x14   :  { %1850 = vmatprep.subr.bf16.mxu1 %v2048_v0  ;;  %1868 = vmatprep.subr.bf16.mxu0 %v2048_v0  ;;  %v42_v2 = vld [vmem:[%s2238_s1] sm:$0xff]  ;;  %v43_v3 = vld [vmem:[%s2238_s1 + $0x8] sm:$0xff]  ;;  %v44_v4 = vld [vmem:[%s2238_s1 + $0x10] sm:$0xff]  ;;  %s2051_s10 = smov [#allocation5]   ;;  %vm1542_vm2 = vcmask 130048  }
  0x15   :  { %1660 = vmatprep.mubr.msk.f32.mxu1 %vm2049_vm0, %v2050_v1  ;;  %1693 = vmatprep.mubr.msk.f32.mxu0 %vm2049_vm0, %v2050_v1  ;;  %v58_v5 = vand.u32 4294901760, %v42_v2  ;;  %v61_v6 = vand.u32 4294901760, %v43_v3  ;;  %v45_v7 = vld [vmem:[%s2238_s1 + $0x18] sm:$0xff]  ;;  %v64_v8 = vand.u32 4294901760, %v44_v4  ;;  %v41_v9 = vld [vmem:[%s2237_s0] sm:$0xff]  ;;  %v544_v42 = vld [vmem:[#allocation2 + $0x8] sm:$0xff] }
  0x16   :  { %v67_v10 = vand.u32 4294901760, %v45_v7  ;;  %v55_v11 = vsel %vm53_vm1, %v41_v9, 0  ;;  %v543_v41 = vld [vmem:[#allocation2] sm:$0xff]  ;;  %v561_v44 = vand.u32 4294901760, %v544_v42  ;;  %v545_v48 = vld [vmem:[#allocation2 + $0x10] sm:$0xff]  ;;  %v546_v49 = vld [vmem:[#allocation2 + $0x18] sm:$0xff] }
  0x17   :  { %v1851_v12 = vpack.c.bf16 %v61_v6, %v58_v5  ;;  %v138_v13 = vsub.f32 %v42_v2, %v58_v5  ;;  %v145_v14 = vsub.f32 %v43_v3, %v61_v6  ;;  %v152_v15 = vsub.f32 %v44_v4, %v64_v8  ;;  %s1550_s11 = sshll.u32 %s2051_s10, 4  ;;  %s1551_s11 = int_to_ptr.vmem [resolvable:$true] %s1550_s11 }
  0x18   :  { %v159_v16 = vsub.f32 %v45_v7, %v67_v10  ;;  %v126_v17 = vand.u32 4294901760, %v55_v11  ;;  %v1854_v18 = vpack.c.bf16 %v67_v10, %v64_v8  ;;  %v558_v43 = vand.u32 4294901760, %v543_v41  ;;  %s2019_s12 = scalar_lea.vmem %s1551_s11, 128  ;;  %p2024_p9 = scmp.lt.s32.totalorder %s1551_s11, %s1551_s11 }
  0x19   :  { %1852 = vmatpush3.bf16.msra.mxu1 %v1851_v12  ;;  %1870 = vmatpush3.bf16.msra.mxu0 %v1851_v12  ;;  %v139_v19 = vand.u32 4294901760, %v138_v13  ;;  %v146_v20 = vand.u32 4294901760, %v145_v14  ;;  %v153_v21 = vand.u32 4294901760, %v152_v15  ;;  %v1863_v39 = vpack.c.bf16 %v145_v14, %v138_v13  ;;  %p2020_p8 = scmp.ne.s32.totalorder %s1551_s11, %s2019_s12  ;;  %p2025_p10 = scmp.lt.s32.totalorder %s2019_s12, %s2019_s12 }
  0x1a   :  { %1853 = vmatprep.subr.bf16.mxu1 %v2048_v0  ;;  %1871 = vmatprep.subr.bf16.mxu0 %v2048_v0  ;;  %v127_v22 = vsub.f32 %v55_v11, %v126_v17  ;;  %v160_v23 = vand.u32 4294901760, %v159_v16  ;;  %v1866_v40 = vpack.c.bf16 %v159_v16, %v152_v15  ;;  %v2150_v45 = vpack.c.bf16 %v561_v44, %v558_v43  ;;  %v1559_v11 = vld [vmem:[%s2239_s2] ss:$0 sm:$0xff] }
  0x1b   :  { %v140_v24 = vsub.f32 %v138_v13, %v139_v19  ;;  %v147_v25 = vsub.f32 %v145_v14, %v146_v20  ;;  %v154_v26 = vsub.f32 %v152_v15, %v153_v21  ;;  %v1875_v31 = vpack.c.bf16 %v146_v20, %v139_v19  ;;  %p2026_p11 = por %p2025_p10, %p2024_p9 }
  0x1c   :  { %v128_v27 = vand.u32 4294901760, %v127_v22  ;;  %v161_v28 = vsub.f32 %v159_v16, %v160_v23  ;;  %v1878_v37 = vpack.c.bf16 %v160_v23, %v153_v21  ;;  %v638_v46 = vsub.f32 %v543_v41, %v558_v43 }
  0x1d   :  { %1855 = vmatpush3.bf16.msra.mxu1 %v1854_v18  ;;  %1873 = vmatpush3.bf16.msra.mxu0 %v1854_v18  ;;  %v141_v29 = vand.u32 4294901760, %v140_v24  ;;  %v148_v30 = vand.u32 4294901760, %v147_v25  ;;  %v155_v34 = vand.u32 4294901760, %v154_v26  ;;  %v645_v47 = vsub.f32 %v544_v42, %v561_v44  ;;  %v1043_v25 = vld [vmem:[%s2242_s5] sm:$0xff]  ;;  %v1044_v26 = vld [vmem:[%s2242_s5 + $0x8] sm:$0xff]  ;;  %p2027_p12 = pnand %p2026_p11, %p2020_p8 }
  0x1e   :  { %v129_v32 = vsub.f32 %v127_v22, %v128_v27  ;;  %1856 = vmatprep.subr.bf16.mxu1 %v2048_v0  ;;  %1874 = vmatprep.subr.bf16.mxu0 %v2048_v0  ;;  %v162_v35 = vand.u32 4294901760, %v161_v28  ;;  %v564_v50 = vand.u32 4294901760, %v545_v48  ;;  %v567_v51 = vand.u32 4294901760, %v546_v49 }
  0x1f   :  { %v1857_v33 = vpack.c.bf16 %v148_v30, %v141_v29  ;;  %v639_v52 = vand.u32 4294901760, %v638_v46  ;;  %v646_v53 = vand.u32 4294901760, %v645_v47  ;;  %v1899_v7 = vpack.c.bf16 %v645_v47, %v638_v46 }
  0x20   :  { %v130_v36 = vand.u32 4294901760, %v129_v32  ;;  %1694 = vmatmul.mubr.f32.vlgmr.msra.gmra.mrb[0].mxu0 %v128_v27  ;;  %v1860_v38 = vpack.c.bf16 %v162_v35, %v155_v34  ;;  %v1890_v54 = vpack.c.bf16 %v567_v51, %v564_v50  ;;  %v652_v55 = vsub.f32 %v545_v48, %v564_v50  ;;  %v1045_v32 = vld [vmem:[%s2242_s5 + $0x10] sm:$0xff] }
  0x21   :  { %1876 = vmatpush3.bf16.msra.mxu0 %v1875_v31  ;;  %1704 = vmatprep.mubr.msk.f32.mxu0 %vm2049_vm0, %v2050_v1  ;;  %v659_v56 = vsub.f32 %v546_v49, %v567_v51  ;;  %v640_v57 = vsub.f32 %v638_v46, %v639_v52  ;;  %v647_v58 = vsub.f32 %v645_v47, %v646_v53  ;;  %v1058_v27 = vand.u32 4294901760, %v1043_v25 }
  0x22   :  { %1661 = vmatmul.mubr.f32.vlgmr.msra.gmra.mrb[0].mxu1 %v130_v36  ;;  %1877 = vmatprep.subr.bf16.mxu0 %v2048_v0  ;;  %v653_v60 = vand.u32 4294901760, %v652_v55  ;;  %v1911_v9 = vpack.c.bf16 %v646_v53, %v639_v52  ;;  %v1061_v28 = vand.u32 4294901760, %v1044_v26  ;;  %v1064_v34 = vand.u32 4294901760, %v1045_v32 }
  0x23   :  { %1858 = vmatpush3.bf16.msra.mxu1 %v1857_v33  ;;  %1671 = vmatprep.mubr.msk.f32.mxu1 %vm2049_vm0, %v2050_v1  ;;  %v641_v59 = vand.u32 4294901760, %v640_v57  ;;  %v660_v61 = vand.u32 4294901760, %v659_v56  ;;  %v648_v62 = vand.u32 4294901760, %v647_v58  ;;  %v1902_v8 = vpack.c.bf16 %v659_v56, %v652_v55  ;;  %v1046_v33 = vld [vmem:[%s2242_s5 + $0x18] sm:$0xff]  ;;  %v1560_v57 = vld [vmem:[%s2241_s4] ss:$0 sm:$0xff] }
  0x24   :  { %1859 = vmatprep.subr.bf16.mxu1 %v2048_v0  ;;  %v654_v63 = vsub.f32 %v652_v55, %v653_v60  ;;  %v2186_v29 = vpack.c.bf16 %v1061_v28, %v1058_v27  ;;  %v1138_v30 = vsub.f32 %v1043_v25, %v1058_v27  ;;  %v1145_v31 = vsub.f32 %v1044_v26, %v1061_v28 }
  0x25   :  { %1879 = vmatpush3.bf16.msra.mxu0 %v1878_v37  ;;  %v661_v2 = vsub.f32 %v659_v56, %v660_v61  ;;  %v1893_v3 = vpack.c.bf16 %v648_v62, %v641_v59  ;;  %v1914_v10 = vpack.c.bf16 %v660_v61, %v653_v60  ;;  %v1067_v35 = vand.u32 4294901760, %v1046_v33 }
  0x26   :  { %1880 = vmatprep.subr.bf16.mxu0 %v2048_v0  ;;  %v655_v4 = vand.u32 4294901760, %v654_v63  ;;  %v1139_v36 = vand.u32 4294901760, %v1138_v30  ;;  %v1146_v37 = vand.u32 4294901760, %v1145_v31  ;;  %v1935_v53 = vpack.c.bf16 %v1145_v31, %v1138_v30 }
  0x27   :  { %1861 = vmatpush3.bf16.msra.mxu1 %v1860_v38  ;;  %v662_v5 = vand.u32 4294901760, %v661_v2  ;;  %v1926_v38 = vpack.c.bf16 %v1067_v35, %v1064_v34 }
  0x28   :  { %1862 = vmatprep.subr.bf16.mxu1 %v2048_v0  ;;  %1705 = vmatmul.mubr.f32.vlgmr.msra.gmra.mrb[0].mxu0 %v126_v17  ;;  %v1140_v41 = vsub.f32 %v1138_v30, %v1139_v36  ;;  %v1147_v42 = vsub.f32 %v1145_v31, %v1146_v37  ;;  %v1947_v55 = vpack.c.bf16 %v1146_v37, %v1139_v36 }
  0x29   :  { %1882 = vmatpush3.bf16.msra.mxu0 %v1851_v12  ;;  %1715 = vmatprep.mubr.msk.f32.mxu0 %vm2049_vm0, %v2050_v1  ;;  %v1896_v6 = vpack.c.bf16 %v662_v5, %v655_v4 }
  0x2a   :  { %1672 = vmatmul.mubr.f32.vlgmr.msra.gmra.mrb[0].mxu1 %v126_v17  ;;  %1883 = vmatprep.subr.bf16.mxu0 %v2048_v0  ;;  %v1141_v43 = vand.u32 4294901760, %v1140_v41  ;;  %v1148_v46 = vand.u32 4294901760, %v1147_v42 }
  0x2b   :  { %1864 = vmatpush3.bf16.msra.mxu1 %v1863_v39  ;;  %1682 = vmatprep.mubr.msk.f32.mxu1 %vm2049_vm0, %v2050_v1  ;;  %v1152_v39 = vsub.f32 %v1045_v32, %v1064_v34 }
  0x2c   :  { %1865 = vmatprep.subr.bf16.mxu1 %v2048_v0  ;;  %v1929_v49 = vpack.c.bf16 %v1148_v46, %v1141_v43 }
  0x2d   :  { %1885 = vmatpush3.bf16.msra.mxu0 %v1854_v18  ;;  %v1153_v44 = vand.u32 4294901760, %v1152_v39 }
  0x2e   :  { %1922 = vmatprep.subr.bf16.mxu0 %v2048_v0 }
  0x2f   :  { %1867 = vmatpush3.bf16.msra.mxu1 %v1866_v40  ;;  %v1159_v40 = vsub.f32 %v1046_v33, %v1067_v35  ;;  %v1154_v47 = vsub.f32 %v1152_v39, %v1153_v44 }
  0x30   :  { %1716 = vmatmul.mubr.f32.vlgmr.msra.gmra.mrb[0].mxu0 %v126_v17  ;;  %1886 = vmatprep.subr.bf16.mxu1 %v2048_v0 }
  0x31   :  { %1792 = vmatprep.mubr.msk.f32.mxu0 %vm2049_vm0, %v2050_v1  ;;  %1924 = vmatpush3.bf16.msra.mxu0 %v2186_v29  ;;  %v1155_v50 = vand.u32 4294901760, %v1154_v47 }
  0x32   :  { %1683 = vmatmul.mubr.f32.vlgmr.msra.gmra.mrb[0].mxu1 %v127_v22  ;;  %1925 = vmatprep.subr.bf16.mxu0 %v2048_v0 }
  0x33   :  { %1726 = vmatprep.mubr.msk.f32.mxu1 %vm2049_vm0, %v2050_v1  ;;  %1888 = vmatpush3.bf16.msra.mxu1 %v2150_v45 }
  0x34   :  { %1889 = vmatprep.subr.bf16.mxu1 %v2048_v0 }
  0x35   :  { %1927 = vmatpush3.bf16.msra.mxu0 %v1926_v38 }
  0x36   :  { %1928 = vmatprep.subr.bf16.mxu0 %v2048_v0 }
  0x37   :  { %1891 = vmatpush3.bf16.msra.mxu1 %v1890_v54 }
  0x38   :  { %1892 = vmatprep.subr.bf16.mxu1 %v2048_v0 }
 0x103   :  { %v538_v12 = vpop.f32.mrb[0].mxu0 }
 0x104   :  { %v1717_v13 = vpop.f32.mrb[1].mxu0 }
 0x105   :  { %v303_v14 = vpop.f32.mrb[0].mxu1 }
 0x106   :  { %v1958_v15 = vadd.f32 %v1559_v11, %v303_v14  ;;  %v1684_v16 = vpop.f32.mrb[1].mxu1 }
 0x108   :  { %v1959_v17 = vadd.f32 %v1958_v15, %v538_v12 }
 0x10a   :  { %v542_v18 = vmax.f32 %v1959_v17, 0.0 }
 0x10c   :  { %v555_v19 = vsel %vm53_vm1, %v542_v18, 0 }
 0x10d   :  { %v626_v20 = vand.u32 4294901760, %v555_v19 }
 0x10f   :  { %v627_v21 = vsub.f32 %v555_v19, %v626_v20 }
 0x111   :  { %v628_v22 = vand.u32 4294901760, %v627_v21 }
 0x113   :  { %v629_v23 = vsub.f32 %v627_v21, %v628_v22 }
 0x115   :  { %v630_v24 = vand.u32 4294901760, %v629_v23 }
 0x117   :  { %1727 = vmatmul.mubr.f32.vlgmr.msra.gmra.mrb[2].mxu1 %v630_v24 }
 0x118   :  { %1894 = vmatpush3.bf16.msra.mxu1 %v1893_v3  ;;  %1737 = vmatprep.mubr.msk.f32.mxu1 %vm2049_vm0, %v2050_v1 }
 0x119   :  { %1895 = vmatprep.subr.bf16.mxu1 %v2048_v0 }
 0x11c   :  { %1897 = vmatpush3.bf16.msra.mxu1 %v1896_v6  ;;  %v1561_v6 = vld [vmem:[%s2243_s6] ss:$0 sm:$0xff] }
 0x11d   :  { %1898 = vmatprep.subr.bf16.mxu1 %v2048_v0 }
 0x11f   :  { %1738 = vmatmul.mubr.f32.vlgmr.msra.gmra.mrb[2].mxu1 %v626_v20 }
 0x120   :  { %1900 = vmatpush3.bf16.msra.mxu1 %v1899_v7  ;;  %1748 = vmatprep.mubr.msk.f32.mxu1 %vm2049_vm0, %v2050_v1 }
 0x121   :  { %1901 = vmatprep.subr.bf16.mxu1 %v2048_v0 }
 0x124   :  { %1903 = vmatpush3.bf16.msra.mxu1 %v1902_v8 }
 0x125   :  { %1904 = vmatprep.subr.bf16.mxu1 %v2048_v0 }
 0x127   :  { %1749 = vmatmul.mubr.f32.vlgmr.msra.gmra.mrb[2].mxu1 %v627_v21 }
 0x128   :  { %1906 = vmatpush3.bf16.msra.mxu1 %v2150_v45  ;;  %1759 = vmatprep.mubr.msk.f32.mxu1 %vm2049_vm0, %v2050_v1 }
 0x129   :  { %1907 = vmatprep.subr.bf16.mxu1 %v2048_v0 }
 0x12c   :  { %1909 = vmatpush3.bf16.msra.mxu1 %v1890_v54 }
 0x12d   :  { %1910 = vmatprep.subr.bf16.mxu1 %v2048_v0 }
 0x12f   :  { %1760 = vmatmul.mubr.f32.vlgmr.msra.gmra.mrb[2].mxu1 %v628_v22 }
 0x130   :  { %1912 = vmatpush3.bf16.msra.mxu1 %v1911_v9  ;;  %1770 = vmatprep.mubr.msk.f32.mxu1 %vm2049_vm0, %v2050_v1 }
 0x131   :  { %1913 = vmatprep.subr.bf16.mxu1 %v2048_v0 }
 0x134   :  { %1915 = vmatpush3.bf16.msra.mxu1 %v1914_v10 }
 0x135   :  { %1916 = vmatprep.subr.bf16.mxu1 %v2048_v0 }
 0x137   :  { %1771 = vmatmul.mubr.f32.vlgmr.msra.gmra.mrb[2].mxu1 %v626_v20 }
 0x138   :  { %1918 = vmatpush3.bf16.msra.mxu1 %v2150_v45  ;;  %1781 = vmatprep.mubr.msk.f32.mxu1 %vm2049_vm0, %v2050_v1  ;;  %v1160_v45 = vand.u32 4294901760, %v1159_v40 }
 0x139   :  { %1919 = vmatprep.subr.bf16.mxu1 %v2048_v0 }
 0x13a   :  { %v1161_v48 = vsub.f32 %v1159_v40, %v1160_v45  ;;  %v1950_v56 = vpack.c.bf16 %v1160_v45, %v1153_v44 }
 0x13c   :  { %1921 = vmatpush3.bf16.msra.mxu1 %v1890_v54  ;;  %v1162_v51 = vand.u32 4294901760, %v1161_v48  ;;  %v1938_v54 = vpack.c.bf16 %v1159_v40, %v1152_v39 }
 0x13e   :  { %v1932_v52 = vpack.c.bf16 %v1162_v51, %v1155_v50 }
 0x13f   :  { %1782 = vmatmul.mubr.f32.vlgmr.msra.gmra.mrb[2].mxu1 %v626_v20 }
 0x212   :  { %v1038_v58 = vpop.f32.mrb[2].mxu1 }
 0x213   :  { %v1960_v59 = vadd.f32 %v1560_v57, %v1038_v58  ;;  %v1783_v60 = vpop.f32.mrb[3].mxu1 }
 0x215   :  { %v1042_v61 = vmax.f32 %v1960_v59, 0.0 }
 0x217   :  { %v1055_v62 = vsel %vm53_vm1, %v1042_v61, 0 }
 0x218   :  { %v1126_v63 = vand.u32 4294901760, %v1055_v62 }
 0x21a   :  { %v1127_v2 = vsub.f32 %v1055_v62, %v1126_v63 }
 0x21c   :  { %v1128_v3 = vand.u32 4294901760, %v1127_v2 }
 0x21e   :  { %v1129_v4 = vsub.f32 %v1127_v2, %v1128_v3 }
 0x220   :  { %v1130_v5 = vand.u32 4294901760, %v1129_v4 }
 0x222   :  { %1793 = vmatmul.mubr.f32.vlgmr.msra.gmra.mrb[2].mxu0 %v1130_v5 }
 0x223   :  { %1930 = vmatpush3.bf16.msra.mxu0 %v1929_v49  ;;  %1803 = vmatprep.mubr.msk.f32.mxu0 %vm2049_vm0, %v2050_v1 }
 0x224   :  { %1931 = vmatprep.subr.bf16.mxu0 %v2048_v0 }
 0x227   :  { %1933 = vmatpush3.bf16.msra.mxu0 %v1932_v52 }
 0x228   :  { %1934 = vmatprep.subr.bf16.mxu0 %v2048_v0 }
 0x22a   :  { %1804 = vmatmul.mubr.f32.vlgmr.msra.gmra.mrb[2].mxu0 %v1126_v63 }
 0x22b   :  { %1936 = vmatpush3.bf16.msra.mxu0 %v1935_v53  ;;  %1814 = vmatprep.mubr.msk.f32.mxu0 %vm2049_vm0, %v2050_v1 }
 0x22c   :  { %1937 = vmatprep.subr.bf16.mxu0 %v2048_v0 }
 0x22f   :  { %1939 = vmatpush3.bf16.msra.mxu0 %v1938_v54 }
 0x230   :  { %1940 = vmatprep.subr.bf16.mxu0 %v2048_v0 }
 0x232   :  { %1815 = vmatmul.mubr.f32.vlgmr.msra.gmra.mrb[2].mxu0 %v1127_v2 }
 0x233   :  { %1942 = vmatpush3.bf16.msra.mxu0 %v2186_v29  ;;  %1825 = vmatprep.mubr.msk.f32.mxu0 %vm2049_vm0, %v2050_v1 }
 0x234   :  { %1943 = vmatprep.subr.bf16.mxu0 %v2048_v0 }
 0x237   :  { %1945 = vmatpush3.bf16.msra.mxu0 %v1926_v38 }
 0x238   :  { %1946 = vmatprep.subr.bf16.mxu0 %v2048_v0 }
 0x23a   :  { %1826 = vmatmul.mubr.f32.vlgmr.msra.gmra.mrb[2].mxu0 %v1128_v3 }
 0x23b   :  { %1948 = vmatpush3.bf16.msra.mxu0 %v1947_v55  ;;  %1836 = vmatprep.mubr.msk.f32.mxu0 %vm2049_vm0, %v2050_v1 }
 0x23c   :  { %1949 = vmatprep.subr.bf16.mxu0 %v2048_v0 }
 0x23f   :  { %1951 = vmatpush3.bf16.msra.mxu0 %v1950_v56 }
 0x240   :  { %1952 = vmatprep.subr.bf16.mxu0 %v2048_v0 }
 0x242   :  { %1837 = vmatmul.mubr.f32.vlgmr.msra.gmra.mrb[2].mxu0 %v1126_v63 }
 0x243   :  { %1954 = vmatpush3.bf16.msra.mxu0 %v2186_v29  ;;  %1847 = vmatprep.mubr.msk.f32.mxu0 %vm2049_vm0, %v2050_v1 }
 0x244   :  { %1955 = vmatprep.subr.bf16.mxu0 %v2048_v0 }
 0x247   :  { %1957 = vmatpush3.bf16.msra.mxu0 %v1926_v38 }
 0x24a   :  { %1848 = vmatmul.mubr.f32.vlgmr.msra.gmra.mrb[2].mxu0 %v1126_v63 }
 0x31d   :  { %v1538_v7 = vpop.f32.mrb[2].mxu0 }
 0x31e   :  { %v1961_v8 = vadd.f32 %v1561_v6, %v1538_v7  ;;  %v1849_v9 = vpop.f32.mrb[3].mxu0 }
 0x320   :  { %1543 = vst.msk [vmem:[#allocation5] sm:$0xff] %vm1542_vm2, %v1961_v8 }
 0x321   :  { %2030 = shalt.err (!%p2027_p12)
}
 0x322   :  { %s2031_s15 = scalar_lea.hbm %s2244_s7, 128 }
 0x323   :  { %p2032_p13 = scmp.ne.s32.totalorder %s2244_s7, %s2031_s15  ;;  %p2035_p0 = scmp.lt.u32.totalorder %s2031_s15, %s2244_s7 }
 0x325   :  { %p2037_p1 = pnand %p2035_p0, %p2032_p13 }
 0x327   :  { %2040 = shalt.err (!%p2037_p1)
}
 0x328   :  { %1553 = dma.vmem_to_hbm [thread:$0]  %s1551_s11, 128, %s2244_s7, [#allocation4]  }
 0x329   :  { %2043 = dma.done.wait [#allocation4], 128  }
 0x32a   :  { %2044 = vsyncadd [#allocation4], 4294967168 }
 0x32b   :  { %1557 = vsyncpa [#allocation3], 1 }
 0x32c   :  { %1558 = vsyncpa [#allocation4], 1 }

</bundles_post_ra>
